<compile_context>
chip_gen: v7x
topology: tpu7x:2x2x1
jax: 0.10.0
libtpu: 0.0.40
codegen_flags: <defaults>
</compile_context>

<pallas_src>
import jax
import jax.numpy as jnp
from jax.experimental import pallas as pl
from jax.experimental.pallas import tpu as pltpu


# ---------------------------------------------------------------------------
# Kernels
# ---------------------------------------------------------------------------
def _residual_kernel_resident(x_ref, w_ref, b_ref, o_ref):
    """out tile = x @ W + b + x; full bf16 weight resident (single-buffered)."""
    x = x_ref[...]                                           # (tm, H) f32
    y = jnp.dot(x.astype(jnp.bfloat16), w_ref[...],          # bf16 MXU, f32 acc
                preferred_element_type=jnp.float32)
    o_ref[...] = (y + b_ref[...] + x).astype(o_ref.dtype)    # f32 epilogue (VPU)


def _residual_kernel_ktiled(xb_ref, xr_ref, w_ref, b_ref, o_ref, acc_ref):
    """K-tiled: acc[i,j] += x_bf16[i,k] @ W[k,j]; epilogue adds bias + f32 x."""
    k = pl.program_id(2)

    @pl.when(k == 0)
    def _():
        acc_ref[...] = jnp.zeros_like(acc_ref)

    acc_ref[...] += jnp.dot(xb_ref[...], w_ref[...],
                            preferred_element_type=jnp.float32)

    @pl.when(k == pl.num_programs(2) - 1)
    def _():
        o_ref[...] = (acc_ref[...] + b_ref[...]
                      + xr_ref[...].astype(jnp.float32)).astype(o_ref.dtype)


# ---------------------------------------------------------------------------
# Planning helpers
# ---------------------------------------------------------------------------
def _largest_divisor(n, candidates):
    for c in candidates:
        if n % c == 0:
            return c
    return None


def _pick_row_tile(m):
    # Prefer >= 2 grid steps (software pipelining + v7x megacore sharding) but
    # never at the cost of dropping below 256 rows (MXU feed / per-step
    # overhead amortization); below that, take the largest divisor — a single
    # grid step is fine for tiny M.
    for c in (1024, 512, 256):
        if m % c == 0 and m // c >= 2:
            return c
    d = _largest_divisor(m, (2048, 1024, 512, 256, 128, 64, 32, 16, 8))
    return d if d is not None else m


def _vmem_capacity_bytes():
    try:
        return int(pltpu.get_tpu_info().vmem_capacity_bytes)
    except Exception:
        return 64 << 20   # conservative default = v7x per-TensorCore VMEM


# ---------------------------------------------------------------------------
# Wrapper
# ---------------------------------------------------------------------------
def residual_linear(x, w, b, *, out_dtype=None, plan=None, tm=None, tn=None, tk=None):
    """x:[M,H], w:[H,H], b:[H] -> x @ W + b + x : [M,H] (bf16 MXU, f32 acc/skip)."""
    M, H = x.shape
    assert w.shape == (H, H), "Residual requires fn: H -> H"
    assert b.shape == (H,)
    out_dtype = x.dtype if out_dtype is None else jnp.dtype(out_dtype)

    in_isz = jnp.dtype(x.dtype).itemsize
    out_isz = jnp.dtype(out_dtype).itemsize

    # Generation-aware VMEM plan (v5e/v6e: 128 MiB -> ~80 MiB budget, ~96 MiB
    # scoped limit; v7x: 64 MiB per TensorCore -> ~40 MiB budget, ~48 MiB limit).
    vmem_cap = _vmem_capacity_bytes()
    budget = (vmem_cap * 5) // 8
    vmem_limit = (vmem_cap * 3) // 4

    def fast_footprint(tm_):
        # x/out row tiles are double-buffered by the pipeline; the grid-invariant
        # weight and bias are whole-array VMEM operands -> counted once.
        return 2 * tm_ * H * (in_isz + out_isz) + H * H * 2 + H * 4

    def ktiled_footprint(tm_, tn_, tk_):
        dbl = (tm_ * tk_ * 2             # bf16 x block (MXU operand)
               + tm_ * tn_ * in_isz      # f32 residual slab
               + tk_ * tn_ * 2           # bf16 weight slab
               + tn_ * 4                 # bias slab
               + tm_ * tn_ * out_isz)    # output tile
        return 2 * dbl + tm_ * tn_ * 4   # + f32 accumulator scratch

    # ------------------------------------------------------------------ plan
    if plan is None:
        tm_f = tm if tm is not None else _pick_row_tile(M)
        while (fast_footprint(tm_f) > budget and tm_f % 2 == 0
               and M % (tm_f // 2) == 0 and (tm_f // 2) % 8 == 0):
            if tm_f <= 128 and H % 128 == 0:
                break  # don't starve the MXU further; switch to the K-tiled plan
            tm_f //= 2
        if fast_footprint(tm_f) <= budget or H % 128 != 0:
            plan, tm = "resident", tm_f
        else:
            plan = "ktiled"

    w_bf16 = w.astype(jnp.bfloat16)              # cast once: halves weight DMA
    b_row = b.reshape(1, H).astype(jnp.float32)  # f32 bias row for the epilogue

    if plan == "resident":
        if tm is None:
            tm = _pick_row_tile(M)
        assert M % tm == 0, f"tm={tm} must divide M={M}"
        # Graceful fallback (e.g. H with no 128-divisor): raise the scoped-VMEM
        # request up to physical capacity rather than failing the plan.
        vmem_limit = max(vmem_limit, min(fast_footprint(tm) + (8 << 20), vmem_cap))

        grid_spec = pltpu.PrefetchScalarGridSpec(
            num_scalar_prefetch=0,
            grid=(M // tm,),
            in_specs=[
                pl.BlockSpec((tm, H), lambda i: (i, 0)),             # x row tile (f32)
                pl.BlockSpec(memory_space=pltpu.MemorySpace.VMEM),   # whole bf16 weight, 1x
                pl.BlockSpec(memory_space=pltpu.MemorySpace.VMEM),   # bias row, 1x
            ],
            out_specs=pl.BlockSpec((tm, H), lambda i: (i, 0)),
        )
        kernel = _residual_kernel_resident
        operands = (x, w_bf16, b_row)
        dims = ("parallel",)
        # TODO(synk): on v7x, when M // tm == 1, split output columns across the
        # two TensorCores instead of relying on the single row axis.
    else:
        assert H % 128 == 0, "K-tiled plan requires hidden % 128 == 0"
        if tm is None:
            tm = _largest_divisor(M, (512, 256, 128, 64, 32, 16, 8)) or M
        if tn is None:
            tn = _largest_divisor(H, (512, 256, 128))
        if tk is None:
            tk = _largest_divisor(H, (2048, 1024, 512, 256, 128))
        # Greedy shrink until the double-buffered footprint fits the budget.
        while ktiled_footprint(tm, tn, tk) > budget and tk > 128 and H % (tk // 2) == 0:
            tk //= 2
        while ktiled_footprint(tm, tn, tk) > budget and tn > 128 and H % (tn // 2) == 0:
            tn //= 2
        while (ktiled_footprint(tm, tn, tk) > budget and tm >= 16
               and M % (tm // 2) == 0 and (tm // 2) % 8 == 0):
            tm //= 2
        assert M % tm == 0 and H % tn == 0 and H % tk == 0

        # With the reduction axis innermost, total HBM re-streaming depends on
        # the tile sizes (weight re-read M/tm times, bf16 x re-read H/tn times),
        # not on the (i, j) loop order, so rows stay the outer (parallel) axis.
        grid_spec = pltpu.PrefetchScalarGridSpec(
            num_scalar_prefetch=0,
            grid=(M // tm, H // tn, H // tk),
            in_specs=[
                pl.BlockSpec((tm, tk), lambda i, j, k: (i, k)),   # bf16 x (MXU operand)
                pl.BlockSpec((tm, tn), lambda i, j, k: (i, j)),   # f32 residual slab
                pl.BlockSpec((tk, tn), lambda i, j, k: (k, j)),   # bf16 weight slab
                pl.BlockSpec((1, tn),  lambda i, j, k: (0, j)),   # bias slab
            ],
            out_specs=pl.BlockSpec((tm, tn), lambda i, j, k: (i, j)),
            scratch_shapes=[pltpu.VMEM((tm, tn), jnp.float32)],
        )
        kernel = _residual_kernel_ktiled
        operands = (x.astype(jnp.bfloat16), x, w_bf16, b_row)
        dims = ("parallel", "parallel", "arbitrary")

    return pl.pallas_call(
        kernel,
        out_shape=jax.ShapeDtypeStruct((M, H), out_dtype),
        grid_spec=grid_spec,
        compiler_params=pltpu.CompilerParams(
            dimension_semantics=dims,
            vmem_limit_bytes=int(vmem_limit),
        ),
    )(*operands)


if __name__ == "__main__":
    key = jax.random.PRNGKey(0)
    kx, kw, kb, kx2, kw2, kb2 = jax.random.split(key, 6)

    # --- Test 1: module-consistent small shapes (batch=2, seq=8, hidden=128),
    #             exercises the fast fully-resident-weight path. ---
    batch, seq, hidden = 2, 8, 128
    x = jax.random.normal(kx, (batch, seq, hidden), dtype=jnp.float32)
    w = jax.random.normal(kw, (hidden, hidden), dtype=jnp.float32) / jnp.sqrt(float(hidden))
    b = jax.random.normal(kb, (hidden,), dtype=jnp.float32) * 0.01

    x2d = x.reshape(batch * seq, hidden)          # glue reshape in plain JAX
    out2d = residual_linear(x2d, w, b)
    out = out2d.reshape(batch, seq, hidden)
    jax.block_until_ready(out)

    # Reference with the same numerics as the kernel (bf16 operands, f32
    # accumulation, f32 bias + residual add).
    ref2d = (jnp.dot(x2d.astype(jnp.bfloat16), w.astype(jnp.bfloat16),
                     preferred_element_type=jnp.float32) + b + x2d)
    ref = ref2d.reshape(batch, seq, hidden)
    assert jnp.allclose(out, ref, atol=1e-3, rtol=1e-3), "mismatch vs bf16 reference"

    # Loose sanity check against the full-f32 reference (bf16 rounding only).
    ref_f32 = jnp.einsum("bsh,hk->bsk", x, w) + b + x
    assert jnp.allclose(out, ref_f32, atol=5e-2, rtol=5e-2), "mismatch vs f32 reference"

    # --- Test 2: force the K-tiled path (3-D grid, f32 accumulator scratch,
    #             bf16 x stream + f32 residual slab) at a small size. ---
    M2, H2 = 64, 256
    x2 = jax.random.normal(kx2, (M2, H2), dtype=jnp.float32)
    w2 = jax.random.normal(kw2, (H2, H2), dtype=jnp.float32) / jnp.sqrt(float(H2))
    b2 = jax.random.normal(kb2, (H2,), dtype=jnp.float32) * 0.01

    out2 = residual_linear(x2, w2, b2, plan="ktiled", tm=32, tn=128, tk=128)
    jax.block_until_ready(out2)
    ref2 = (jnp.dot(x2.astype(jnp.bfloat16), w2.astype(jnp.bfloat16),
                    preferred_element_type=jnp.float32) + b2 + x2)
    assert jnp.allclose(out2, ref2, atol=1e-3, rtol=1e-3), "K-tiled path mismatch"

    print("KERNEL_OK")
</pallas_src>

<mosaic_0001>
module attributes {stable_mosaic.version = 11 : i64} {
  func.func @_residual_kernel_resident(%arg0: i32, %arg1: memref<16x128xf32, #tpu.memory_space<vmem>>, %arg2: memref<128x128xbf16, #tpu.memory_space<vmem>>, %arg3: memref<1x128xf32, #tpu.memory_space<vmem>>, %arg4: memref<16x128xf32, #tpu.memory_space<vmem>>) attributes {dimension_semantics = [#tpu.dimension_semantics<parallel>], iteration_bounds = array<i64: 1>, scalar_prefetch = 0 : i64, scratch_operands = 0 : i64, tpu.core_type = #tpu.core_type<tc>, window_params = [{transform_indices = @transform_0, window_bounds = array<i64: 16, 128>}, {pipeline_mode = #tpu.pipeline_mode<synchronous>, transform_indices = @transform_1, window_bounds = array<i64: 128, 128>}, {pipeline_mode = #tpu.pipeline_mode<synchronous>, transform_indices = @transform_2, window_bounds = array<i64: 1, 128>}, {transform_indices = @transform_3, window_bounds = array<i64: 16, 128>}]} {
    %c0 = arith.constant 0 : index
    %c0_0 = arith.constant 0 : index
    %0 = vector.load %arg1[%c0, %c0_0] : memref<16x128xf32, #tpu.memory_space<vmem>>, vector<16x128xf32>
    %1 = arith.truncf %0 : vector<16x128xf32> to vector<16x128xbf16>
    %c0_1 = arith.constant 0 : index
    %c0_2 = arith.constant 0 : index
    %2 = vector.load %arg2[%c0_1, %c0_2] : memref<128x128xbf16, #tpu.memory_space<vmem>>, vector<128x128xbf16>
    %cst = arith.constant dense<0.000000e+00> : vector<16x128xf32>
    %3 = tpu.matmul %1, %2, %cst {dimension_numbers = #tpu.dot_dimension_numbers<[1], [0], [0], [1], [0, 0, 1, 1], [], []>} : vector<16x128xbf16>, vector<128x128xbf16>, vector<16x128xf32> -> vector<16x128xf32>
    %c0_3 = arith.constant 0 : index
    %c0_4 = arith.constant 0 : index
    %4 = vector.load %arg3[%c0_3, %c0_4] : memref<1x128xf32, #tpu.memory_space<vmem>>, vector<1x128xf32>
    %5 = vector.broadcast %4 : vector<1x128xf32> to vector<16x128xf32>
    %6 = arith.addf %3, %5 : vector<16x128xf32>
    %7 = arith.addf %6, %0 : vector<16x128xf32>
    %c0_5 = arith.constant 0 : index
    %c0_6 = arith.constant 0 : index
    %8 = vector.load %arg4[%c0_5, %c0_6] : memref<16x128xf32, #tpu.memory_space<vmem>>, vector<16x128xf32>
    tpu.vector_store %arg4[%c0_5, %c0_6], %7 {strides = array<i32>} : memref<16x128xf32, #tpu.memory_space<vmem>>, vector<16x128xf32>,
    return
  }
  func.func @transform_0(%arg0: i32) -> (i32, i32) {
    %c0_i32 = arith.constant 0 : i32
    %c0_i32_0 = arith.constant 0 : i32
    return %arg0, %c0_i32 : i32, i32
  }
  func.func @transform_1(%arg0: i32) -> (i32, i32) {
    %c0_i32 = arith.constant 0 : i32
    %c0_i32_0 = arith.constant 0 : i32
    %c0_i32_1 = arith.constant 0 : i32
    return %c0_i32, %c0_i32_0 : i32, i32
  }
  func.func @transform_2(%arg0: i32) -> (i32, i32) {
    %c0_i32 = arith.constant 0 : i32
    %c0_i32_0 = arith.constant 0 : i32
    %c0_i32_1 = arith.constant 0 : i32
    return %c0_i32, %c0_i32_0 : i32, i32
  }
  func.func @transform_3(%arg0: i32) -> (i32, i32) {
    %c0_i32 = arith.constant 0 : i32
    %c0_i32_0 = arith.constant 0 : i32
    return %arg0, %c0_i32 : i32, i32
  }
}

</mosaic_0001>

<bundles_post_ra>
// kernel: tpu_custom_call.1
= control target key start
LH: loop header
LB: loop body
LE: loop exit
PB: predicated region body
PF: predicated region fallthrough
CT: control target
= control target key end

     0   :  { %8 = vsyncpa [#allocation3], 0  ;;  %s382_s0 = inlined_call_operand.hbm [shape: f32[16,128], index: 0, kind: input, shape index: {}]   ;;  %s383_s1 = inlined_call_operand.hbm [shape: bf16[128,128], index: 1, kind: input, shape index: {}]   ;;  %s384_s2 = inlined_call_operand.vmem [shape: f32[1,128], index: 2, kind: input, shape index: {}]   ;;  %s385_s3 = inlined_call_operand.hbm [shape: f32[16,128], index: 3, kind: output, shape index: {}]  }
   0x1   :  { %9 = vsyncpa [#allocation6], 0 }
   0x2   :  { %10 = vsyncpa [#allocation4], 0  ;;  %s308_s12 = smov [#allocation2]   ;;  %s236_s16 = scalar_lea.hbm %s382_s0, 256 }
   0x3   :  { %s16_s13 = sshll.u32 %s308_s12, 4  ;;  %p237_p0 = scmp.ne.s32.totalorder %s382_s0, %s236_s16  ;;  %s17_s13 = int_to_ptr.vmem [resolvable:$true] %s16_s13 }
   0x4   :  { %p240_p1 = scmp.lt.u32.totalorder %s236_s16, %s382_s0 }
   0x6   :  { %p242_p2 = pnand %p240_p1, %p237_p0 }
   0x8   :  { %245 = shalt.err (!%p242_p2)
}
   0x9   :  { %s246_s21 = scalar_lea.vmem %s17_s13, 256  ;;  %p251_p4 = scmp.lt.s32.totalorder %s17_s13, %s17_s13 }
   0xa   :  { %p247_p3 = scmp.ne.s32.totalorder %s17_s13, %s246_s21  ;;  %p252_p5 = scmp.lt.s32.totalorder %s246_s21, %s246_s21 }
   0xc   :  { %p253_p6 = por %p252_p5, %p251_p4 }
   0xe   :  { %p254_p7 = pnand %p253_p6, %p247_p3 }
  0x10   :  { %257 = shalt.err (!%p254_p7)
}
  0x11   :  { %s309_s22 = smov 128   ;;  %s310_s23 = smov 8  }
  0x12   :  { %22 = dma.hbm_to_vmem [thread:$0]  %s382_s0, 256, %s17_s13, [#allocation3], %s309_s22, %s309_s22, %s310_s23  }
  0x13   :  { %s311_s26 = smov [#allocation5]   ;;  %s258_s30 = scalar_lea.hbm %s383_s1, 1024 }
  0x14   :  { %s28_s27 = sshll.u32 %s311_s26, 4  ;;  %p259_p8 = scmp.ne.s32.totalorder %s383_s1, %s258_s30  ;;  %s29_s27 = int_to_ptr.vmem [resolvable:$true] %s28_s27 }
  0x15   :  { %p262_p9 = scmp.lt.u32.totalorder %s258_s30, %s383_s1 }
  0x17   :  { %p264_p10 = pnand %p262_p9, %p259_p8 }
  0x19   :  { %267 = shalt.err (!%p264_p10)
}
  0x1a   :  { %s268_s8 = scalar_lea.vmem %s29_s27, 1024  ;;  %p273_p12 = scmp.lt.s32.totalorder %s29_s27, %s29_s27 }
  0x1b   :  { %p269_p11 = scmp.ne.s32.totalorder %s29_s27, %s268_s8  ;;  %p274_p13 = scmp.lt.s32.totalorder %s268_s8, %s268_s8 }
  0x1d   :  { %p275_p0 = por %p274_p13, %p273_p12 }
  0x1f   :  { %p276_p1 = pnand %p275_p0, %p269_p11 }
  0x21   :  { %279 = shalt.err (!%p276_p1)
}
  0x22   :  { %s312_s0 = smov 64   ;;  %s313_s9 = smov 4  }
  0x23   :  { %34 = dma.hbm_to_vmem [thread:$0]  %s383_s1, 1024, %s29_s27, [#allocation6], %s312_s0, %s312_s0, %s313_s9  }
  0x24   :  { %302 = dma.done.wait [#allocation3], 256  }
  0x25   :  { %303 = vsyncadd [#allocation3], 4294967040 }
  0x26   :  { %304 = dma.done.wait [#allocation6], 1024  }
  0x27   :  { %305 = vsyncadd [#allocation6], 4294966272  ;;  %v314_v0 = vmov 0.0   ;;  %vm315_vm0 = vmmov 0   ;;  %v228_v1 = vld [vmem:[#allocation5] sm:$0xff]   ;;  %v229_v2 = vld [vmem:[#allocation5 + $0x8] sm:$0xff]  }
  0x28   :  { %199 = vmatprep.subr.bf16.mxu0 %v314_v0  ;;  %215 = vmatprep.mubr.msk.bf16.mxu0 %vm315_vm0, %v314_v0  ;;  %v230_v3 = vld [vmem:[#allocation5 + $0x10] sm:$0xff]   ;;  %v231_v4 = vld [vmem:[#allocation5 + $0x18] sm:$0xff]   ;;  %v232_v5 = vld [vmem:[#allocation5 + $0x20] sm:$0xff]   ;;  %s316_s13 = smov [#allocation7]  }
  0x29   :  { %200 = vmatpush3.bf16.msra.mxu0 %v228_v1  ;;  %v233_v6 = vld [vmem:[#allocation5 + $0x28] sm:$0xff]   ;;  %v234_v7 = vld [vmem:[#allocation5 + $0x30] sm:$0xff]   ;;  %v235_v8 = vld [vmem:[#allocation5 + $0x38] sm:$0xff]   ;;  %s168_s14 = sshll.u32 %s316_s13, 4  ;;  %s169_s14 = int_to_ptr.vmem [resolvable:$true] %s168_s14 }
  0x2a   :  { %201 = vmatprep.subr.bf16.mxu0 %v314_v0  ;;  %v44_v9 = vld [vmem:[#allocation2] sm:$0xff]  ;;  %v45_v10 = vld [vmem:[#allocation2 + $0x8] sm:$0xff]  ;;  %s280_s15 = scalar_lea.vmem %s169_s14, 256  ;;  %p285_p3 = scmp.lt.s32.totalorder %s169_s14, %s169_s14 }
  0x2b   :  { %v46_v11 = vpack.c.bf16 %v45_v10, %v44_v9  ;;  %v181_v12 = vld [vmem:[%s384_s2] ss:$0 sm:$0xff]  ;;  %p281_p2 = scmp.ne.s32.totalorder %s169_s14, %s280_s15  ;;  %p286_p4 = scmp.lt.s32.totalorder %s280_s15, %s280_s15 }
  0x2d   :  { %202 = vmatpush3.bf16.msra.mxu0 %v229_v2  ;;  %p287_p5 = por %p286_p4, %p285_p3 }
  0x2e   :  { %203 = vmatprep.subr.bf16.mxu0 %v314_v0 }
  0x2f   :  { %p288_p6 = pnand %p287_p5, %p281_p2 }
  0x31   :  { %204 = vmatpush3.bf16.msra.mxu0 %v230_v3 }
  0x32   :  { %205 = vmatprep.subr.bf16.mxu0 %v314_v0 }
  0x35   :  { %206 = vmatpush3.bf16.msra.mxu0 %v231_v4 }
  0x36   :  { %207 = vmatprep.subr.bf16.mxu0 %v314_v0 }
  0x39   :  { %208 = vmatpush3.bf16.msra.mxu0 %v232_v5 }
  0x3a   :  { %209 = vmatprep.subr.bf16.mxu0 %v314_v0 }
  0x3d   :  { %210 = vmatpush3.bf16.msra.mxu0 %v233_v6 }
  0x3e   :  { %211 = vmatprep.subr.bf16.mxu0 %v314_v0 }
  0x41   :  { %212 = vmatpush3.bf16.msra.mxu0 %v234_v7 }
  0x42   :  { %213 = vmatprep.subr.bf16.mxu0 %v314_v0 }
  0x45   :  { %214 = vmatpush3.bf16.msra.mxu0 %v235_v8 }
  0x48   :  { %216 = vmatmul.mubr.bf16.vlgmr.msra.gmra.mrb[0].mxu0 %v46_v11 }
 0x11b   :  { %v152_v13 = vpop.f32.mrb[0].mxu0 }
 0x11c   :  { %v153_v14 = vadd.f32 %v181_v12, %v152_v13  ;;  %v217_v15 = vpop.f32.mrb[1].mxu0 }
 0x11d   :  { %v155_v16 = vpop.f32.mrb[2].mxu0 }
 0x11e   :  { %v159_v17 = vadd.f32 %v153_v14, %v44_v9  ;;  %v156_v18 = vadd.f32 %v181_v12, %v155_v16  ;;  %v218_v19 = vpop.f32.mrb[3].mxu0 }
 0x120   :  { %161 = vst [vmem:[#allocation7] sm:$0xff] %v159_v17  ;;  %v160_v20 = vadd.f32 %v156_v18, %v45_v10 }
 0x122   :  { %162 = vst [vmem:[#allocation7 + $0x8] sm:$0xff] %v160_v20 }
 0x123   :  { %291 = shalt.err (!%p288_p6)
}
 0x124   :  { %s292_s17 = scalar_lea.hbm %s385_s3, 256 }
 0x125   :  { %p293_p7 = scmp.ne.s32.totalorder %s385_s3, %s292_s17  ;;  %p296_p8 = scmp.lt.u32.totalorder %s292_s17, %s385_s3 }
 0x127   :  { %p298_p9 = pnand %p296_p8, %p293_p7 }
 0x129   :  { %301 = shalt.err (!%p298_p9)
}
 0x12a   :  { %174 = dma.vmem_to_hbm [thread:$0]  %s169_s14, 256, %s385_s3, [#allocation4], %s309_s22, %s309_s22, %s310_s23  }
 0x12b   :  { %306 = dma.done.wait [#allocation4], 256  }
 0x12c   :  { %307 = vsyncadd [#allocation4], 4294967040 }
 0x12d   :  { %178 = vsyncpa [#allocation3], 1 }
 0x12e   :  { %179 = vsyncpa [#allocation6], 1 }
 0x12f   :  { %180 = vsyncpa [#allocation4], 1 }

</bundles_post_ra>
